<compile_context>
chip_gen: v7x
topology: tpu7x:2x2x1
jax: 0.10.0
libtpu: 0.0.40
codegen_flags: <defaults>
</compile_context>

<pallas_src>
import math

import jax
import jax.numpy as jnp
from jax.experimental import pallas as pl
from jax.experimental.pallas import tpu as pltpu


def _label_embed_kernel(labels_ref, keep_ref, w_ref, b_ref, out_ref):
    # token_drop as a multiply: keep == 1.0 for kept rows, 0.0 for dropped rows.
    lab = labels_ref[...] * keep_ref[...]                       # (TB, Cp)
    # embedding_proj: labels @ W^T + b  (W passed pre-transposed: (Cp, Hp))
    acc = jnp.dot(lab, w_ref[...], preferred_element_type=jnp.float32)
    out_ref[...] = (acc + b_ref[...]).astype(out_ref.dtype)


def _round_up(x, m):
    return ((x + m - 1) // m) * m


def label_embedder_forward(labels, weight, bias, *, dropout_prob=0.1,
                           train=True, force_drop_ids=None, rng_key=None,
                           block_b=256, compute_dtype=jnp.bfloat16):
    """Pallas implementation of LabelEmbedder.forward.

    labels:  (B, num_classes) float
    weight:  (hidden_size, num_classes)  -- PyTorch nn.Linear layout
    bias:    (hidden_size,)
    force_drop_ids: optional (B,) int array; rows with value 1 are dropped.
    rng_key: used only when train and dropout_prob > 0 and force_drop_ids is None.
    """
    B, C = labels.shape
    H, Cw = weight.shape
    assert Cw == C, (weight.shape, labels.shape)

    # --- drop mask (glue, outside the kernel; matches torch.rand(...) < p) ---
    use_dropout = dropout_prob > 0
    if (train and use_dropout) or (force_drop_ids is not None):
        if force_drop_ids is None:
            if rng_key is None:
                raise ValueError("rng_key required for random token_drop")
            drop = jax.random.uniform(rng_key, (B,)) < dropout_prob
        else:
            drop = force_drop_ids == 1
    else:
        drop = jnp.zeros((B,), bool)
    keep = jnp.logical_not(drop).astype(compute_dtype).reshape(B, 1)

    # --- one-time padding so every block is (8,128)-aligned and lane-dense ---
    Cp = _round_up(C, 128)                 # MXU K dim
    Hp = _round_up(H, 128)                 # output lane dim -> full vst, no masks
    TB = min(block_b, _round_up(B, 8))     # batch tile
    Bp = _round_up(B, TB)

    lab_c = labels.astype(compute_dtype)
    if (Bp, Cp) != (B, C):
        lab_c = jnp.pad(lab_c, ((0, Bp - B), (0, Cp - C)))
    if Bp != B:
        keep = jnp.pad(keep, ((0, Bp - B), (0, 0)))
    w_t = weight.T.astype(compute_dtype)   # (C, H) so the kernel does lab @ w_t
    if (Cp, Hp) != (C, H):
        w_t = jnp.pad(w_t, ((0, Cp - C), (0, Hp - H)))
    b2d = bias.astype(jnp.float32).reshape(1, H)
    if Hp != H:
        b2d = jnp.pad(b2d, ((0, 0), (0, Hp - H)))

    out_dtype = labels.dtype
    grid = (Bp // TB,)

    # VMEM budget: resident weight/bias + double-buffered per-block tiles.
    cbytes = jnp.dtype(compute_dtype).itemsize
    obytes = jnp.dtype(out_dtype).itemsize
    vmem_bytes = (Cp * Hp * cbytes + Hp * 4
                  + 2 * (TB * Cp * cbytes + TB * cbytes + TB * Hp * obytes))
    vmem_limit = int(max(32 * 1024 * 1024, min(2 * vmem_bytes, 64 * 1024 * 1024)))

    out = pl.pallas_call(
        _label_embed_kernel,
        out_shape=jax.ShapeDtypeStruct((Bp, Hp), out_dtype),
        grid=grid,
        in_specs=[
            pl.BlockSpec((TB, Cp), lambda i: (i, 0)),   # labels: streamed per tile
            pl.BlockSpec((TB, 1), lambda i: (i, 0)),    # keep mask per tile
            pl.BlockSpec((Cp, Hp), lambda i: (0, 0)),   # weight: VMEM-resident
            pl.BlockSpec((1, Hp), lambda i: (0, 0)),    # bias: VMEM-resident
        ],
        out_specs=pl.BlockSpec((TB, Hp), lambda i: (i, 0)),
        compiler_params=pltpu.CompilerParams(
            dimension_semantics=("parallel",),          # megacore sharding on v7x
            vmem_limit_bytes=vmem_limit),
    )(lab_c, keep, w_t, b2d)

    if (Bp, Hp) != (B, H):
        out = out[:B, :H]
    return out


if __name__ == "__main__":
    num_classes = 16
    hidden_size = 32
    batch = 8
    dropout_prob = 0.1

    key = jax.random.PRNGKey(0)
    k_lab, k_w, k_b, k_drop = jax.random.split(key, 4)

    # "labels" are dense class vectors (Linear is applied directly),
    # e.g. one-hot / soft labels of shape (B, num_classes).
    labels = jax.random.normal(k_lab, (batch, num_classes), jnp.float32)

    # Deterministic nn.Linear-style init: U(-1/sqrt(in), 1/sqrt(in))
    bound = 1.0 / math.sqrt(num_classes)
    weight = jax.random.uniform(k_w, (hidden_size, num_classes),
                                jnp.float32, -bound, bound)
    bias = jax.random.uniform(k_b, (hidden_size,), jnp.float32, -bound, bound)

    # Deterministic drop pattern via force_drop_ids (same semantics as
    # token_drop with force_drop_ids supplied).
    force_drop_ids = (jax.random.uniform(k_drop, (batch,)) < dropout_prob
                      ).astype(jnp.int32)

    out = label_embedder_forward(labels, weight, bias,
                                 dropout_prob=dropout_prob,
                                 train=True,
                                 force_drop_ids=force_drop_ids)
    out = jax.block_until_ready(out)

    # Reference in plain JAX, with the same bf16 rounding applied to the MXU
    # operands (kernel accumulates in f32 and adds bias in f32).
    lab_ref = jnp.where((force_drop_ids == 1)[:, None],
                        jnp.zeros_like(labels), labels)
    lab_bf = lab_ref.astype(jnp.bfloat16).astype(jnp.float32)
    w_bf = weight.astype(jnp.bfloat16).astype(jnp.float32)
    ref = lab_bf @ w_bf.T + bias

    assert out.shape == (batch, hidden_size)
    assert jnp.allclose(out, ref, atol=1e-4, rtol=1e-4), \
        float(jnp.max(jnp.abs(out - ref)))

    print("KERNEL_OK")
</pallas_src>

<mosaic_0001>
module attributes {stable_mosaic.version = 11 : i64} {
  func.func @_label_embed_kernel(%arg0: i32, %arg1: memref<8x128xbf16, #tpu.memory_space<vmem>>, %arg2: memref<8x1xbf16, #tpu.memory_space<vmem>>, %arg3: memref<128x128xbf16, #tpu.memory_space<vmem>>, %arg4: memref<1x128xf32, #tpu.memory_space<vmem>>, %arg5: memref<8x128xf32, #tpu.memory_space<vmem>>) attributes {dimension_semantics = [#tpu.dimension_semantics<parallel>], iteration_bounds = array<i64: 1>, scalar_prefetch = 0 : i64, scratch_operands = 0 : i64, tpu.core_type = #tpu.core_type<tc>, window_params = [{transform_indices = @transform_0, window_bounds = array<i64: 8, 128>}, {transform_indices = @transform_1, window_bounds = array<i64: 8, 1>}, {pipeline_mode = #tpu.pipeline_mode<synchronous>, transform_indices = @transform_2, window_bounds = array<i64: 128, 128>}, {pipeline_mode = #tpu.pipeline_mode<synchronous>, transform_indices = @transform_3, window_bounds = array<i64: 1, 128>}, {transform_indices = @transform_4, window_bounds = array<i64: 8, 128>}]} {
    %c0 = arith.constant 0 : index
    %c0_0 = arith.constant 0 : index
    %0 = vector.load %arg1[%c0, %c0_0] : memref<8x128xbf16, #tpu.memory_space<vmem>>, vector<8x128xbf16>
    %c0_1 = arith.constant 0 : index
    %c0_2 = arith.constant 0 : index
    %1 = vector.load %arg2[%c0_1, %c0_2] : memref<8x1xbf16, #tpu.memory_space<vmem>>, vector<8x1xbf16>
    %2 = vector.broadcast %1 : vector<8x1xbf16> to vector<8x128xbf16>
    %3 = arith.mulf %0, %2 : vector<8x128xbf16>
    %c0_3 = arith.constant 0 : index
    %c0_4 = arith.constant 0 : index
    %4 = vector.load %arg3[%c0_3, %c0_4] : memref<128x128xbf16, #tpu.memory_space<vmem>>, vector<128x128xbf16>
    %cst = arith.constant dense<0.000000e+00> : vector<8x128xf32>
    %5 = tpu.matmul %3, %4, %cst {dimension_numbers = #tpu.dot_dimension_numbers<[1], [0], [0], [1], [0, 0, 1, 1], [], []>} : vector<8x128xbf16>, vector<128x128xbf16>, vector<8x128xf32> -> vector<8x128xf32>
    %c0_5 = arith.constant 0 : index
    %c0_6 = arith.constant 0 : index
    %6 = vector.load %arg4[%c0_5, %c0_6] : memref<1x128xf32, #tpu.memory_space<vmem>>, vector<1x128xf32>
    %7 = vector.broadcast %6 : vector<1x128xf32> to vector<8x128xf32>
    %8 = arith.addf %5, %7 : vector<8x128xf32>
    %c0_7 = arith.constant 0 : index
    %c0_8 = arith.constant 0 : index
    %9 = vector.load %arg5[%c0_7, %c0_8] : memref<8x128xf32, #tpu.memory_space<vmem>>, vector<8x128xf32>
    tpu.vector_store %arg5[%c0_7, %c0_8], %8 {strides = array<i32>} : memref<8x128xf32, #tpu.memory_space<vmem>>, vector<8x128xf32>,
    return
  }
  func.func @transform_0(%arg0: i32) -> (i32, i32) {
    %c0_i32 = arith.constant 0 : i32
    %c0_i32_0 = arith.constant 0 : i32
    return %arg0, %c0_i32 : i32, i32
  }
  func.func @transform_1(%arg0: i32) -> (i32, i32) {
    %c0_i32 = arith.constant 0 : i32
    %c0_i32_0 = arith.constant 0 : i32
    return %arg0, %c0_i32 : i32, i32
  }
  func.func @transform_2(%arg0: i32) -> (i32, i32) {
    %c0_i32 = arith.constant 0 : i32
    %c0_i32_0 = arith.constant 0 : i32
    %c0_i32_1 = arith.constant 0 : i32
    return %c0_i32, %c0_i32_0 : i32, i32
  }
  func.func @transform_3(%arg0: i32) -> (i32, i32) {
    %c0_i32 = arith.constant 0 : i32
    %c0_i32_0 = arith.constant 0 : i32
    %c0_i32_1 = arith.constant 0 : i32
    return %c0_i32, %c0_i32_0 : i32, i32
  }
  func.func @transform_4(%arg0: i32) -> (i32, i32) {
    %c0_i32 = arith.constant 0 : i32
    %c0_i32_0 = arith.constant 0 : i32
    return %arg0, %c0_i32 : i32, i32
  }
}

</mosaic_0001>

<bundles_post_ra>
// kernel: tpu_custom_call.1
= control target key start
LH: loop header
LB: loop body
LE: loop exit
PB: predicated region body
PF: predicated region fallthrough
CT: control target
= control target key end

     0   :  { %9 = vsyncpa [#allocation3], 0  ;;  %s344_s0 = inlined_call_operand.vmem [shape: bf16[8,128], index: 0, kind: input, shape index: {}]   ;;  %s345_s1 = inlined_call_operand.vmem [shape: bf16[8,1], index: 1, kind: input, shape index: {}]   ;;  %s346_s2 = inlined_call_operand.hbm [shape: bf16[128,128], index: 2, kind: input, shape index: {}]   ;;  %s347_s3 = inlined_call_operand.vmem [shape: f32[1,128], index: 3, kind: input, shape index: {}]   ;;  %s348_s4 = inlined_call_operand.hbm [shape: f32[8,128], index: 4, kind: output, shape index: {}]  }
   0x1   :  { %10 = vsyncpa [#allocation4], 0  ;;  %s278_s15 = smov [#allocation2]   ;;  %s230_s19 = scalar_lea.hbm %s346_s2, 1024 }
   0x2   :  { %s20_s16 = sshll.u32 %s278_s15, 4  ;;  %p231_p0 = scmp.ne.s32.totalorder %s346_s2, %s230_s19  ;;  %s21_s16 = int_to_ptr.vmem [resolvable:$true] %s20_s16 }
   0x3   :  { %p234_p1 = scmp.lt.u32.totalorder %s230_s19, %s346_s2 }
   0x5   :  { %p236_p2 = pnand %p234_p1, %p231_p0 }
   0x7   :  { %239 = shalt.err (!%p236_p2)
}
   0x8   :  { %s240_s24 = scalar_lea.vmem %s21_s16, 1024  ;;  %p245_p4 = scmp.lt.s32.totalorder %s21_s16, %s21_s16 }
   0x9   :  { %p241_p3 = scmp.ne.s32.totalorder %s21_s16, %s240_s24  ;;  %p246_p5 = scmp.lt.s32.totalorder %s240_s24, %s240_s24 }
   0xb   :  { %p247_p6 = por %p246_p5, %p245_p4 }
   0xd   :  { %p248_p7 = pnand %p247_p6, %p241_p3 }
   0xf   :  { %251 = shalt.err (!%p248_p7)
}
  0x10   :  { %s279_s25 = smov 64   ;;  %s280_s26 = smov 4  }
  0x11   :  { %26 = dma.hbm_to_vmem [thread:$0]  %s346_s2, 1024, %s21_s16, [#allocation3], %s279_s25, %s279_s25, %s280_s26  }
  0x12   :  { %274 = dma.done.wait [#allocation3], 1024  }
  0x13   :  { %275 = vsyncadd [#allocation3], 4294966272  ;;  %v281_v0 = vmov 0   ;;  %v282_v1 = vmov 0.0   ;;  %v34_v2 = vld [vmem:[%s345_s1] sm:$0xf]  ;;  %v43_v13 = vlaneseq }
  0x14   :  { %221 = vset.pattern.permute.xlu0 %v281_v0  ;;  %193 = vmatprep.subr.bf16.mxu0 %v282_v1  ;;  %v222_v3 = vld [vmem:[#allocation2] sm:$0xff]   ;;  %v223_v4 = vld [vmem:[#allocation2 + $0x8] sm:$0xff]   ;;  %vm283_vm0 = vmmov 0   ;;  %v224_v5 = vld [vmem:[#allocation2 + $0x10] sm:$0xff]   ;;  %v284_v11 = vmov 839922192  }
  0x15   :  { %37 = vperm.xlu0 %221, %v34_v2   ;;  %194 = vmatpush3.bf16.msra.mxu0 %v222_v3  ;;  %v225_v6 = vld [vmem:[#allocation2 + $0x18] sm:$0xff]   ;;  %v226_v7 = vld [vmem:[#allocation2 + $0x20] sm:$0xff]   ;;  %v227_v8 = vld [vmem:[#allocation2 + $0x28] sm:$0xff]   ;;  %v41_v12 = vunpack.c.l.s4 %v284_v11  ;;  %v44_v15 = vshrl.u32 %v43_v13, 7  ;;  %s285_s7 = smov [#allocation5]  }
  0x16   :  { %195 = vmatprep.subr.bf16.mxu0 %v282_v1  ;;  %209 = vmatprep.mubr.msk.bf16.mxu0 %vm283_vm0, %v282_v1  ;;  %v228_v9 = vld [vmem:[#allocation2 + $0x30] sm:$0xff]   ;;  %v229_v10 = vld [vmem:[#allocation2 + $0x38] sm:$0xff]   ;;  %v33_v18 = vld [vmem:[%s344_s0] sm:$0xf]  ;;  %s166_s8 = sshll.u32 %s285_s7, 4  ;;  %s167_s8 = int_to_ptr.vmem [resolvable:$true] %s166_s8 }
  0x17   :  { %v42_v14 = vunpack.c.0.s8 %v41_v12  ;;  %v175_v21 = vld [vmem:[%s347_s3] ss:$0 sm:$0xff]  ;;  %s252_s9 = scalar_lea.vmem %s167_s8, 128  ;;  %p257_p9 = scmp.lt.s32.totalorder %s167_s8, %s167_s8 }
  0x18   :  { %p253_p8 = scmp.ne.s32.totalorder %s167_s8, %s252_s9  ;;  %p258_p10 = scmp.lt.s32.totalorder %s252_s9, %s252_s9 }
  0x19   :  { %196 = vmatpush3.bf16.msra.mxu0 %v223_v4  ;;  %v45_v16 = vsub.s32 %v42_v14, %v44_v15 }
  0x1a   :  { %197 = vmatprep.subr.bf16.mxu0 %v282_v1  ;;  %p259_p11 = por %p258_p10, %p257_p9 }
  0x1c   :  { %p260_p12 = pnand %p259_p11, %p253_p8 }
  0x1d   :  { %198 = vmatpush3.bf16.msra.mxu0 %v224_v5 }
  0x1e   :  { %199 = vmatprep.subr.bf16.mxu0 %v282_v1 }
  0x21   :  { %200 = vmatpush3.bf16.msra.mxu0 %v225_v6 }
  0x22   :  { %201 = vmatprep.subr.bf16.mxu0 %v282_v1 }
  0x25   :  { %202 = vmatpush3.bf16.msra.mxu0 %v226_v7 }
  0x26   :  { %203 = vmatprep.subr.bf16.mxu0 %v282_v1 }
  0x29   :  { %204 = vmatpush3.bf16.msra.mxu0 %v227_v8 }
  0x2a   :  { %205 = vmatprep.subr.bf16.mxu0 %v282_v1 }
  0x2d   :  { %206 = vmatpush3.bf16.msra.mxu0 %v228_v9 }
  0x2e   :  { %207 = vmatprep.subr.bf16.mxu0 %v282_v1 }
  0x31   :  { %208 = vmatpush3.bf16.msra.mxu0 %v229_v10 }
  0x94   :  { %v38_v17 = vpop.permute.xlu0 %37 }
  0x95   :  { %v46_v19 = vrot.slane %v38_v17, %v45_v16 }
  0x97   :  { %v47_v20 = vmul.bf16 %v46_v19, %v33_v18 }
  0x99   :  { %210 = vmatmul.mubr.bf16.vlgmr.msra.gmra.mrb[0].mxu0 %v47_v20 }
 0x16c   :  { %v153_v22 = vpop.f32.mrb[0].mxu0 }
 0x16d   :  { %v154_v23 = vadd.f32 %v175_v21, %v153_v22  ;;  %v211_v24 = vpop.f32.mrb[1].mxu0 }
 0x16e   :  { %v156_v25 = vpop.f32.mrb[2].mxu0 }
 0x16f   :  { %159 = vst [vmem:[#allocation5] sm:$0xff] %v154_v23  ;;  %v212_v26 = vpop.f32.mrb[3].mxu0 }
 0x170   :  { %263 = shalt.err (!%p260_p12)
}
 0x171   :  { %s264_s3 = scalar_lea.hbm %s348_s4, 128 }
 0x172   :  { %p265_p13 = scmp.ne.s32.totalorder %s348_s4, %s264_s3  ;;  %p268_p0 = scmp.lt.u32.totalorder %s264_s3, %s348_s4 }
 0x174   :  { %p270_p1 = pnand %p268_p0, %p265_p13 }
 0x176   :  { %273 = shalt.err (!%p270_p1)
}
 0x177   :  { %169 = dma.vmem_to_hbm [thread:$0]  %s167_s8, 128, %s348_s4, [#allocation4]  }
 0x178   :  { %276 = dma.done.wait [#allocation4], 128  }
 0x179   :  { %277 = vsyncadd [#allocation4], 4294967168 }
 0x17a   :  { %173 = vsyncpa [#allocation3], 1 }
 0x17b   :  { %174 = vsyncpa [#allocation4], 1 }

</bundles_post_ra>
